<compile_context>
chip_gen: v5e
topology: v5e:2x2
jax: 0.10.0
libtpu: 0.0.40
codegen_flags: <defaults>
</compile_context>

<pallas_src>
import functools

import jax
import jax.numpy as jnp
from jax.experimental import pallas as pl
from jax.experimental.pallas import tpu as pltpu

LANE = 128
SUBLANE = 8
TM_MAX = 2048            # rows of 128 per block -> ~1 MiB f32 per input per block
NUM_CORE_SPLITS = 2      # shard the reduction across v7x's two TensorCores


def _iou_partial_kernel(x_ref, t_ref, inter_ref, total_ref, *, tm, rows,
                        blocks_per_split, need_mask):
    j = pl.program_id(1)  # reduction step within this core split ("arbitrary")

    # Output blocks are resident across the reduction axis: init once per split.
    @pl.when(j == 0)
    def _init():
        inter_ref[...] = jnp.zeros_like(inter_ref)
        total_ref[...] = jnp.zeros_like(total_ref)

    # Cast after load so low-precision inputs stream at their HBM width.
    x = x_ref[...].astype(jnp.float32)
    t = t_ref[...].astype(jnp.float32)
    s = jax.nn.sigmoid(x)

    if need_mask:
        # Mask rows beyond the true row count (boundary block padding and any
        # duplicated clamped block on the second core split).  Pure VPU work.
        c = pl.program_id(0)
        row0 = (c * blocks_per_split + j) * tm
        gid = row0 + jax.lax.broadcasted_iota(jnp.int32, (tm, LANE), 0)
        valid = gid < rows
        s = jnp.where(valid, s, 0.0)
        t = jnp.where(valid, t, 0.0)

    # Per-step partial reduce: fold groups of 8 rows onto one (8,128) vreg tile
    # with plain elementwise adds; no per-step cross-lane (XLU) reduction.
    pi = (s * t).reshape(tm // SUBLANE, SUBLANE, LANE).sum(axis=0)
    pt = (s + t).reshape(tm // SUBLANE, SUBLANE, LANE).sum(axis=0)
    inter_ref[...] += pi[None]
    total_ref[...] += pt[None]


@jax.jit
def iou_loss(inputs, targets, smooth=1.0):
    """Pallas implementation of IoULoss.forward(inputs, targets, smooth)."""
    x = inputs.reshape(-1)
    t = targets.reshape(-1)
    n = x.shape[0]

    chunk = SUBLANE * LANE                 # 1024 elements
    n_main = (n // chunk) * chunk          # main region, multiple of 8*128
    rows = n_main // LANE                  # multiple of 8

    inter = jnp.float32(0.0)
    total = jnp.float32(0.0)

    if rows > 0:
        tm = min(TM_MAX, rows)             # multiple of 8, never exceeds array
        nb = pl.cdiv(rows, tm)             # row blocks in the main region
        nc = NUM_CORE_SPLITS if nb >= NUM_CORE_SPLITS else 1
        bps = pl.cdiv(nb, nc)              # blocks handled per core split
        need_clamp = nc * bps > nb         # second split may run past the end
        need_mask = nc * bps * tm != rows  # boundary/duplicate rows to zero out

        if need_clamp:
            def idx_map(c, j):
                return (jnp.minimum(c * bps + j, nb - 1), 0)
        else:
            def idx_map(c, j):
                return (c * bps + j, 0)

        x2 = x[:n_main].reshape(rows, LANE)
        t2 = t[:n_main].reshape(rows, LANE)

        kernel = functools.partial(
            _iou_partial_kernel, tm=tm, rows=rows,
            blocks_per_split=bps, need_mask=need_mask)

        acc_spec = pl.BlockSpec((1, SUBLANE, LANE), lambda c, j: (c, 0, 0))
        inter_p, total_p = pl.pallas_call(
            kernel,
            out_shape=(
                jax.ShapeDtypeStruct((nc, SUBLANE, LANE), jnp.float32),
                jax.ShapeDtypeStruct((nc, SUBLANE, LANE), jnp.float32),
            ),
            grid_spec=pltpu.PrefetchScalarGridSpec(
                num_scalar_prefetch=0,
                grid=(nc, bps),
                in_specs=[
                    pl.BlockSpec((tm, LANE), idx_map),
                    pl.BlockSpec((tm, LANE), idx_map),
                ],
                out_specs=[acc_spec, acc_spec],
            ),
            compiler_params=pltpu.CompilerParams(
                dimension_semantics=("parallel", "arbitrary")),
        )(x2, t2)

        # Single cross-lane reduction of the vreg-shaped partials.
        inter = inter + jnp.sum(inter_p)
        total = total + jnp.sum(total_p)

    if n_main < n:
        # Ragged tail (< 1024 elements): negligible plain-JAX epilogue instead
        # of re-padding/copying the whole tensor in HBM.
        xt = x[n_main:].astype(jnp.float32)
        tt = t[n_main:].astype(jnp.float32)
        st = jax.nn.sigmoid(xt)
        inter = inter + jnp.sum(st * tt)
        total = total + jnp.sum(st + tt)

    union = total - inter
    return 1.0 - (inter + smooth) / (union + smooth)


def iou_loss_ref(inputs, targets, smooth=1.0):
    s = jax.nn.sigmoid(inputs.reshape(-1).astype(jnp.float32))
    t = targets.reshape(-1).astype(jnp.float32)
    inter = jnp.sum(s * t)
    total = jnp.sum(s + t)
    union = total - inter
    return 1.0 - (inter + smooth) / (union + smooth)


if __name__ == "__main__":
    key = jax.random.PRNGKey(0)
    k1, k2, k3, k4 = jax.random.split(key, 4)

    # Primary small-shape demo: NCHW logits + binary targets (module has no params).
    x = jax.random.normal(k1, (2, 4, 16, 16), dtype=jnp.float32)
    t = (jax.random.uniform(k2, (2, 4, 16, 16)) > 0.5).astype(jnp.float32)
    loss = jax.block_until_ready(iou_loss(x, t, smooth=1.0))
    ref = jax.block_until_ready(iou_loss_ref(x, t, smooth=1.0))
    assert jnp.allclose(loss, ref, rtol=1e-5, atol=1e-5), (loss, ref)

    # Secondary check: exercises multi-block streaming, the two-way core split,
    # in-kernel boundary-row masking and the ragged JAX tail.
    xb = jax.random.normal(k3, (2, 5, 255, 257), dtype=jnp.float32)
    tb = (jax.random.uniform(k4, (2, 5, 255, 257)) > 0.5).astype(jnp.float32)
    loss_b = jax.block_until_ready(iou_loss(xb, tb, smooth=1.0))
    ref_b = jax.block_until_ready(iou_loss_ref(xb, tb, smooth=1.0))
    assert jnp.allclose(loss_b, ref_b, rtol=1e-4, atol=1e-5), (loss_b, ref_b)

    print("KERNEL_OK")
</pallas_src>

<mosaic_0001>
module attributes {stable_mosaic.version = 11 : i64} {
  func.func @_iou_partial_kernel(%arg0: i32, %arg1: i32, %arg2: memref<16x128xf32, #tpu.memory_space<vmem>>, %arg3: memref<16x128xf32, #tpu.memory_space<vmem>>, %arg4: memref<1x8x128xf32, #tpu.memory_space<vmem>>, %arg5: memref<1x8x128xf32, #tpu.memory_space<vmem>>) attributes {dimension_semantics = [#tpu.dimension_semantics<parallel>, #tpu.dimension_semantics<arbitrary>], iteration_bounds = array<i64: 1, 1>, scalar_prefetch = 0 : i64, scratch_operands = 0 : i64, tpu.core_type = #tpu.core_type<tc>, window_params = [{transform_indices = @transform_0, window_bounds = array<i64: 16, 128>}, {transform_indices = @transform_1, window_bounds = array<i64: 16, 128>}, {transform_indices = @transform_2, window_bounds = array<i64: 1, 8, 128>}, {transform_indices = @transform_3, window_bounds = array<i64: 1, 8, 128>}]} {
    %c0_i32 = arith.constant 0 : i32
    %0 = arith.cmpi eq, %arg1, %c0_i32 : i32
    %1 = arith.extui %0 : i1 to i32
    %c0_i32_0 = arith.constant 0 : i32
    %2 = arith.cmpi ne, %1, %c0_i32_0 : i32
    scf.if %2 {
      %cst_18 = arith.constant 0.000000e+00 : f32
      %24 = vector.broadcast %cst_18 : f32 to vector<1x8x128xf32>
      %c0_19 = arith.constant 0 : index
      %c0_20 = arith.constant 0 : index
      %c0_21 = arith.constant 0 : index
      %25 = vector.load %arg4[%c0_19, %c0_20, %c0_21] : memref<1x8x128xf32, #tpu.memory_space<vmem>>, vector<1x8x128xf32>
      tpu.vector_store %arg4[%c0_19, %c0_20, %c0_21], %24 {strides = array<i32>} : memref<1x8x128xf32, #tpu.memory_space<vmem>>, vector<1x8x128xf32>,
      %cst_22 = arith.constant 0.000000e+00 : f32
      %26 = vector.broadcast %cst_22 : f32 to vector<1x8x128xf32>
      %c0_23 = arith.constant 0 : index
      %c0_24 = arith.constant 0 : index
      %c0_25 = arith.constant 0 : index
      %27 = vector.load %arg5[%c0_23, %c0_24, %c0_25] : memref<1x8x128xf32, #tpu.memory_space<vmem>>, vector<1x8x128xf32>
      tpu.vector_store %arg5[%c0_23, %c0_24, %c0_25], %26 {strides = array<i32>} : memref<1x8x128xf32, #tpu.memory_space<vmem>>, vector<1x8x128xf32>,
    } else {
    }
    %c0 = arith.constant 0 : index
    %c0_1 = arith.constant 0 : index
    %3 = vector.load %arg2[%c0, %c0_1] : memref<16x128xf32, #tpu.memory_space<vmem>>, vector<16x128xf32>
    %c0_2 = arith.constant 0 : index
    %c0_3 = arith.constant 0 : index
    %4 = vector.load %arg3[%c0_2, %c0_3] : memref<16x128xf32, #tpu.memory_space<vmem>>, vector<16x128xf32>
    %5 = arith.negf %3 : vector<16x128xf32>
    %6 = math.exp %5 : vector<16x128xf32>
    %cst = arith.constant 1.000000e+00 : f32
    %7 = vector.broadcast %cst : f32 to vector<16x128xf32>
    %8 = arith.addf %7, %6 : vector<16x128xf32>
    %9 = arith.divf %7, %8 : vector<16x128xf32>
    %10 = arith.mulf %9, %4 : vector<16x128xf32>
    %11 = vector.shape_cast %10 : vector<16x128xf32> to vector<2x8x128xf32>
    %cst_4 = arith.constant dense<0.000000e+00> : vector<8x128xf32>
    %12 = vector.multi_reduction <add>, %11, %cst_4 [0] : vector<2x8x128xf32> to vector<8x128xf32>
    %13 = arith.addf %9, %4 : vector<16x128xf32>
    %14 = vector.shape_cast %13 : vector<16x128xf32> to vector<2x8x128xf32>
    %cst_5 = arith.constant dense<0.000000e+00> : vector<8x128xf32>
    %15 = vector.multi_reduction <add>, %14, %cst_5 [0] : vector<2x8x128xf32> to vector<8x128xf32>
    %c0_6 = arith.constant 0 : index
    %c0_7 = arith.constant 0 : index
    %c0_8 = arith.constant 0 : index
    %16 = vector.load %arg4[%c0_6, %c0_7, %c0_8] : memref<1x8x128xf32, #tpu.memory_space<vmem>>, vector<1x8x128xf32>
    %17 = vector.shape_cast %12 : vector<8x128xf32> to vector<1x8x128xf32>
    %18 = arith.addf %16, %17 : vector<1x8x128xf32>
    %c0_9 = arith.constant 0 : index
    %c0_10 = arith.constant 0 : index
    %c0_11 = arith.constant 0 : index
    %19 = vector.load %arg4[%c0_9, %c0_10, %c0_11] : memref<1x8x128xf32, #tpu.memory_space<vmem>>, vector<1x8x128xf32>
    tpu.vector_store %arg4[%c0_9, %c0_10, %c0_11], %18 {strides = array<i32>} : memref<1x8x128xf32, #tpu.memory_space<vmem>>, vector<1x8x128xf32>,
    %c0_12 = arith.constant 0 : index
    %c0_13 = arith.constant 0 : index
    %c0_14 = arith.constant 0 : index
    %20 = vector.load %arg5[%c0_12, %c0_13, %c0_14] : memref<1x8x128xf32, #tpu.memory_space<vmem>>, vector<1x8x128xf32>
    %21 = vector.shape_cast %15 : vector<8x128xf32> to vector<1x8x128xf32>
    %22 = arith.addf %20, %21 : vector<1x8x128xf32>
    %c0_15 = arith.constant 0 : index
    %c0_16 = arith.constant 0 : index
    %c0_17 = arith.constant 0 : index
    %23 = vector.load %arg5[%c0_15, %c0_16, %c0_17] : memref<1x8x128xf32, #tpu.memory_space<vmem>>, vector<1x8x128xf32>
    tpu.vector_store %arg5[%c0_15, %c0_16, %c0_17], %22 {strides = array<i32>} : memref<1x8x128xf32, #tpu.memory_space<vmem>>, vector<1x8x128xf32>,
    return
  }
  func.func @transform_0(%arg0: i32, %arg1: i32) -> (i32, i32) {
    %c1_i32 = arith.constant 1 : i32
    %0 = arith.muli %arg0, %c1_i32 : i32
    %1 = arith.addi %0, %arg1 : i32
    %c0_i32 = arith.constant 0 : i32
    %c0_i32_0 = arith.constant 0 : i32
    return %1, %c0_i32 : i32, i32
  }
  func.func @transform_1(%arg0: i32, %arg1: i32) -> (i32, i32) {
    %c1_i32 = arith.constant 1 : i32
    %0 = arith.muli %arg0, %c1_i32 : i32
    %1 = arith.addi %0, %arg1 : i32
    %c0_i32 = arith.constant 0 : i32
    %c0_i32_0 = arith.constant 0 : i32
    return %1, %c0_i32 : i32, i32
  }
  func.func @transform_2(%arg0: i32, %arg1: i32) -> (i32, i32, i32) {
    %c0_i32 = arith.constant 0 : i32
    %c0_i32_0 = arith.constant 0 : i32
    %c0_i32_1 = arith.constant 0 : i32
    return %arg0, %c0_i32, %c0_i32_0 : i32, i32, i32
  }
  func.func @transform_3(%arg0: i32, %arg1: i32) -> (i32, i32, i32) {
    %c0_i32 = arith.constant 0 : i32
    %c0_i32_0 = arith.constant 0 : i32
    %c0_i32_1 = arith.constant 0 : i32
    return %arg0, %c0_i32, %c0_i32_0 : i32, i32, i32
  }
}

</mosaic_0001>

<bundles_post_ra>
// kernel: iou_loss.1
= control target key start
LH: loop header
LB: loop body
LE: loop exit
PB: predicated region body
PF: predicated region fallthrough
CT: control target
= control target key end

     0   :  { %s186_s0 = inlined_call_operand.vmem [shape: f32[16,128], index: 0, kind: input, shape index: {}]   ;;  %s187_s1 = inlined_call_operand.vmem [shape: f32[16,128], index: 1, kind: input, shape index: {}]   ;;  %s188_s2 = inlined_call_operand.vmem [shape: f32[1,8,128], index: 2, kind: output, shape index: {0}]   ;;  %s189_s3 = inlined_call_operand.vmem [shape: f32[1,8,128], index: 3, kind: output, shape index: {1}]  }
   0x1   :  { %v63_v0 = vld [vmem:[%s186_s0] sm:$0xff]  ;;  %v64_v1 = vld [vmem:[%s186_s0 + $0x8] sm:$0xff] }
   0x2   :  { %v137_v2 = vmul.f32 -1.442695, %v63_v0  ;;  %v138_v3 = vmul.f32 -1.442695, %v64_v1  ;;  %v65_v23 = vld [vmem:[%s187_s1] sm:$0xff]  ;;  %v66_v25 = vld [vmem:[%s187_s1 + $0x8] sm:$0xff] }
   0x4   :  { %140 = vpow2.f32 %v137_v2 }
   0x5   :  { %142 = vpow2.f32 %v138_v3 }
   0xa   :  { %v141_v4 = vpop.eup %140 }
   0xb   :  { %v143_v5 = vpop.eup %142  ;;  %v73_v6 = vadd.f32 1.0, %v141_v4 }
   0xc   :  { %v74_v7 = vadd.f32 1.0, %v143_v5 }
   0xd   :  { %144 = vrcp.f32 %v73_v6  ;;  %vm80_vm0 = vweird.f32 %v73_v6  ;;  %v86_v11 = vand.u32 2147483648, %v73_v6  ;;  %v84_v14 = vand.u32 2147483647, %v73_v6 }
   0xe   :  { %146 = vrcp.f32 %v74_v7  ;;  %v101_v15 = vand.u32 2147483648, %v74_v7  ;;  %vm95_vm2 = vweird.f32 %v74_v7  ;;  %v99_v17 = vand.u32 2147483647, %v74_v7 }
   0xf   :  { %v87_v19 = vor.u32 1.1754944e-38, %v86_v11  ;;  %vm85_vm5 = vcmp.eq.f32.partialorder %v84_v14, 8.507059e+37 }
  0x10   :  { %v102_v22 = vor.u32 1.1754944e-38, %v101_v15  ;;  %vm100_vm7 = vcmp.eq.f32.partialorder %v99_v17, 8.507059e+37 }
  0x13   :  { %v145_v8 = vpop.eup %144 }
  0x14   :  { %v147_v9 = vpop.eup %146  ;;  %v76_v10 = vmul.f32 %v145_v8, %v73_v6  ;;  %vm81_vm1 = vweird.f32 %v145_v8 }
  0x15   :  { %v91_v12 = vmul.f32 %v147_v9, %v74_v7  ;;  %vm96_vm3 = vweird.f32 %v147_v9  ;;  %vm82_vm4 = vmor %vm80_vm0, %vm81_vm1 }
  0x16   :  { %v77_v13 = vsub.f32 1.0, %v76_v10  ;;  %vm97_vm6 = vmor %vm95_vm2, %vm96_vm3 }
  0x17   :  { %v92_v16 = vsub.f32 1.0, %v91_v12 }
  0x18   :  { %v78_v18 = vmul.f32 %v145_v8, %v77_v13 }
  0x19   :  { %v93_v20 = vmul.f32 %v147_v9, %v92_v16 }
  0x1a   :  { %v79_v21 = vadd.f32 %v145_v8, %v78_v18 }
  0x1b   :  { %v94_v24 = vadd.f32 %v147_v9, %v93_v20 }
  0x1c   :  { %v83_v26 = vsel %vm82_vm4, %v145_v8, %v79_v21 }
  0x1d   :  { %v88_v27 = vsel %vm85_vm5, %v87_v19, %v83_v26  ;;  %v98_v28 = vsel %vm97_vm6, %v147_v9, %v94_v24 }
  0x1e   :  { %v103_v29 = vsel %vm100_vm7, %v102_v22, %v98_v28  ;;  %v105_v30 = vmul.f32 %v88_v27, %v65_v23  ;;  %v108_v31 = vadd.f32 %v88_v27, %v65_v23 }
  0x1f   :  { %v106_v32 = vmul.f32 %v103_v29, %v66_v25  ;;  %v109_v33 = vadd.f32 %v103_v29, %v66_v25 }
  0x21   :  { %v107_v34 = vadd.f32 %v106_v32, %v105_v30  ;;  %v110_v35 = vadd.f32 %v109_v33, %v108_v31 }
  0x23   :  { %113 = vst [vmem:[%s188_s2] sm:$0xff] %v107_v34 }
  0x24   :  { %116 = vst [vmem:[%s189_s3] sm:$0xff] %v110_v35 }

</bundles_post_ra>
